<compile_context>
chip_gen: v7x
topology: tpu7x:2x2x1
jax: 0.10.0
libtpu: 0.0.40
codegen_flags: <defaults>
</compile_context>

<pallas_src>
import jax
import jax.numpy as jnp
from jax.experimental import pallas as pl
from jax.experimental.pallas import tpu as pltpu


def _round_up(x, m):
    return (x + m - 1) // m * m


def _gate_kernel(left_ref, right_ref, wl_ref, wr_ref, b_ref, out_ref):
    tn = out_ref.shape[-1]
    dp = left_ref.shape[-1]
    j = pl.program_id(1)

    # Native-dtype operands straight into the MXU, f32 accumulation.
    l = left_ref[...]                                   # (tm, Dp)
    r = right_ref[...]                                  # (tm, Dp)
    z = (
        jnp.dot(l, wl_ref[...], preferred_element_type=jnp.float32)
        + jnp.dot(r, wr_ref[...], preferred_element_type=jnp.float32)
        + b_ref[...]                                    # (1, tn) f32, broadcast
    )                                                   # (tm, tn) f32
    g = jax.nn.sigmoid(z)                               # EUP transcendentals

    # Columns of left/right matching this output tile.
    if tn == dp:
        # Single column tile: reuse the operands already loaded for the matmul.
        l_n = l.astype(jnp.float32)
        r_n = r.astype(jnp.float32)
    else:
        col = pl.multiple_of(j * tn, 128)
        l_n = left_ref[:, pl.ds(col, tn)].astype(jnp.float32)
        r_n = right_ref[:, pl.ds(col, tn)].astype(jnp.float32)

    # g*l + (1-g)*r == r + g*(l - r)
    out_ref[...] = (r_n + g * (l_n - r_n)).astype(out_ref.dtype)


def prepare_gate_params(weight, bias):
    """One-time weight prep (hoisted out of the per-call path).

    weight: (D, 2*D) as in torch.nn.Linear(2*D, D).weight
    bias:   (D,)
    Returns lane-padded (w_left_T, w_right_T, bias_row) with feature dim
    rounded up to a multiple of 128; bias_row is stored in f32.
    """
    D = weight.shape[0]
    assert weight.shape == (D, 2 * D)
    Dp = _round_up(D, 128)

    w_left = weight[:, :D].T     # (D, D): kernel computes l @ w_left
    w_right = weight[:, D:].T    # (D, D)
    pad = Dp - D
    if pad:
        w_left = jnp.pad(w_left, ((0, pad), (0, pad)))
        w_right = jnp.pad(w_right, ((0, pad), (0, pad)))
        bias = jnp.pad(bias, (0, pad))
    bias_row = bias.reshape(1, Dp).astype(jnp.float32)
    return w_left, w_right, bias_row


def _pick_tn(Dp, w_itemsize, budget_bytes=16 << 20):
    """Largest tn (multiple of 128, dividing Dp) keeping the two
    double-buffered (Dp, tn) weight blocks within budget (v7x VMEM safety)."""
    n = Dp // 128
    for d in range(n, 0, -1):
        if n % d == 0:
            tn = d * 128
            if 2 * 2 * Dp * tn * w_itemsize <= budget_bytes:
                return tn
    return 128


def my_gate(left, right, w_left, w_right, bias_row, *, tm=512):
    """MyGate forward: sigmoid(concat(l, r) @ W^T + b) blended gate.

    left, right: (..., D)
    w_left, w_right, bias_row: outputs of prepare_gate_params (padded to Dp).
    """
    assert left.shape == right.shape
    D = left.shape[-1]
    Dp = w_left.shape[0]
    assert Dp >= D and Dp % 128 == 0
    lead_shape = left.shape[:-1]
    M = 1
    for s in lead_shape:
        M *= s

    a_isz = jnp.dtype(left.dtype).itemsize
    w_isz = jnp.dtype(w_left.dtype).itemsize

    # N (output-column) tile of the weights.
    tn = _pick_tn(Dp, w_isz)

    # M tile: respect sublane packing, don't over-pad tiny M, fit VMEM.
    sub = 16 if a_isz < 4 else 8
    tm_eff = _round_up(min(tm, _round_up(M, sub)), sub)

    def vmem_est(tm_, tn_):
        return (
            2 * 2 * tm_ * Dp * a_isz    # left + right tiles, double-buffered
            + 2 * 2 * Dp * tn_ * w_isz  # two weight blocks, double-buffered
            + 2 * tn_ * 4               # bias
            + 2 * tm_ * tn_ * a_isz     # output tile, double-buffered
        )

    while vmem_est(tm_eff, tn) > (44 << 20) and tm_eff > sub:
        tm_eff = _round_up(max(sub, tm_eff // 2), sub)

    Mp = _round_up(M, tm_eff)

    left2 = left.reshape(M, D)
    right2 = right.reshape(M, D)
    pad_m, pad_d = Mp - M, Dp - D
    if pad_m or pad_d:
        left2 = jnp.pad(left2, ((0, pad_m), (0, pad_d)))
        right2 = jnp.pad(right2, ((0, pad_m), (0, pad_d)))

    # Column-tile axis is innermost: activation tiles (index (i, 0)) stay
    # resident across it, so only the weight blocks are re-fetched per j.
    grid = (Mp // tm_eff, Dp // tn)

    vmem_limit = min(64 << 20,
                     max(32 << 20, int(vmem_est(tm_eff, tn) * 1.4) + (2 << 20)))

    out = pl.pallas_call(
        _gate_kernel,
        out_shape=jax.ShapeDtypeStruct((Mp, Dp), left.dtype),
        grid_spec=pltpu.PrefetchScalarGridSpec(
            num_scalar_prefetch=0,
            grid=grid,
            in_specs=[
                pl.BlockSpec((tm_eff, Dp), lambda i, j: (i, 0)),  # left tile
                pl.BlockSpec((tm_eff, Dp), lambda i, j: (i, 0)),  # right tile
                pl.BlockSpec((Dp, tn), lambda i, j: (0, j)),      # W_left^T
                pl.BlockSpec((Dp, tn), lambda i, j: (0, j)),      # W_right^T
                pl.BlockSpec((1, tn), lambda i, j: (0, j)),       # bias
            ],
            out_specs=pl.BlockSpec((tm_eff, tn), lambda i, j: (i, j)),
        ),
        compiler_params=pltpu.CompilerParams(
            dimension_semantics=("parallel", "parallel"),
            vmem_limit_bytes=vmem_limit,
        ),
    )(left2, right2, w_left, w_right, bias_row)

    if pad_m or pad_d:
        out = out[:M, :D]
    return out.reshape(*lead_shape, D)


def my_gate_ref(left, right, weight, bias):
    x = jnp.concatenate([left, right], axis=-1)
    g = jax.nn.sigmoid(x @ weight.T + bias)
    return g * left + (1.0 - g) * right


if __name__ == "__main__":
    key = jax.random.PRNGKey(0)
    B, S, D = 2, 8, 32  # small shapes; M = B*S = 16

    k1, k2, k3, k4 = jax.random.split(key, 4)
    left = jax.random.normal(k1, (B, S, D), dtype=jnp.float32)
    right = jax.random.normal(k2, (B, S, D), dtype=jnp.float32)

    # Deterministic parameter init (shapes from nn.Linear(2*D, D)).
    bound = 1.0 / jnp.sqrt(2.0 * D)
    weight = jax.random.uniform(k3, (D, 2 * D), jnp.float32, -bound, bound)
    bias = jax.random.uniform(k4, (D,), jnp.float32, -bound, bound)

    # One-time weight prep (split + transpose + lane padding), reused per call.
    w_left, w_right, bias_row = prepare_gate_params(weight, bias)

    out = my_gate(left, right, w_left, w_right, bias_row)
    out = jax.block_until_ready(out)

    ref = my_gate_ref(left, right, weight, bias)
    assert out.shape == (B, S, D)
    assert jnp.allclose(out, ref, atol=1e-5, rtol=1e-5), "mismatch vs reference"

    print("KERNEL_OK")
</pallas_src>

<mosaic_0001>
module attributes {stable_mosaic.version = 11 : i64} {
  func.func @_gate_kernel(%arg0: i32, %arg1: i32, %arg2: memref<16x128xf32, #tpu.memory_space<vmem>>, %arg3: memref<16x128xf32, #tpu.memory_space<vmem>>, %arg4: memref<128x128xf32, #tpu.memory_space<vmem>>, %arg5: memref<128x128xf32, #tpu.memory_space<vmem>>, %arg6: memref<1x128xf32, #tpu.memory_space<vmem>>, %arg7: memref<16x128xf32, #tpu.memory_space<vmem>>) attributes {dimension_semantics = [#tpu.dimension_semantics<parallel>, #tpu.dimension_semantics<parallel>], iteration_bounds = array<i64: 1, 1>, scalar_prefetch = 0 : i64, scratch_operands = 0 : i64, tpu.core_type = #tpu.core_type<tc>, window_params = [{transform_indices = @transform_0, window_bounds = array<i64: 16, 128>}, {transform_indices = @transform_1, window_bounds = array<i64: 16, 128>}, {transform_indices = @transform_2, window_bounds = array<i64: 128, 128>}, {transform_indices = @transform_3, window_bounds = array<i64: 128, 128>}, {transform_indices = @transform_4, window_bounds = array<i64: 1, 128>}, {transform_indices = @transform_5, window_bounds = array<i64: 16, 128>}]} {
    %c0 = arith.constant 0 : index
    %c0_0 = arith.constant 0 : index
    %0 = vector.load %arg2[%c0, %c0_0] : memref<16x128xf32, #tpu.memory_space<vmem>>, vector<16x128xf32>
    %c0_1 = arith.constant 0 : index
    %c0_2 = arith.constant 0 : index
    %1 = vector.load %arg3[%c0_1, %c0_2] : memref<16x128xf32, #tpu.memory_space<vmem>>, vector<16x128xf32>
    %c0_3 = arith.constant 0 : index
    %c0_4 = arith.constant 0 : index
    %2 = vector.load %arg4[%c0_3, %c0_4] : memref<128x128xf32, #tpu.memory_space<vmem>>, vector<128x128xf32>
    %cst = arith.constant dense<0.000000e+00> : vector<16x128xf32>
    %3 = tpu.matmul %0, %2, %cst {dimension_numbers = #tpu.dot_dimension_numbers<[1], [0], [0], [1], [0, 0, 1, 1], [], []>} : vector<16x128xf32>, vector<128x128xf32>, vector<16x128xf32> -> vector<16x128xf32>
    %c0_5 = arith.constant 0 : index
    %c0_6 = arith.constant 0 : index
    %4 = vector.load %arg5[%c0_5, %c0_6] : memref<128x128xf32, #tpu.memory_space<vmem>>, vector<128x128xf32>
    %cst_7 = arith.constant dense<0.000000e+00> : vector<16x128xf32>
    %5 = tpu.matmul %1, %4, %cst_7 {dimension_numbers = #tpu.dot_dimension_numbers<[1], [0], [0], [1], [0, 0, 1, 1], [], []>} : vector<16x128xf32>, vector<128x128xf32>, vector<16x128xf32> -> vector<16x128xf32>
    %6 = arith.addf %3, %5 : vector<16x128xf32>
    %c0_8 = arith.constant 0 : index
    %c0_9 = arith.constant 0 : index
    %7 = vector.load %arg6[%c0_8, %c0_9] : memref<1x128xf32, #tpu.memory_space<vmem>>, vector<1x128xf32>
    %8 = vector.broadcast %7 : vector<1x128xf32> to vector<16x128xf32>
    %9 = arith.addf %6, %8 : vector<16x128xf32>
    %10 = arith.negf %9 : vector<16x128xf32>
    %11 = math.exp %10 : vector<16x128xf32>
    %cst_10 = arith.constant 1.000000e+00 : f32
    %12 = vector.broadcast %cst_10 : f32 to vector<16x128xf32>
    %13 = arith.addf %12, %11 : vector<16x128xf32>
    %14 = arith.divf %12, %13 : vector<16x128xf32>
    %15 = arith.subf %0, %1 : vector<16x128xf32>
    %16 = arith.mulf %14, %15 : vector<16x128xf32>
    %17 = arith.addf %1, %16 : vector<16x128xf32>
    %c0_11 = arith.constant 0 : index
    %c0_12 = arith.constant 0 : index
    %18 = vector.load %arg7[%c0_11, %c0_12] : memref<16x128xf32, #tpu.memory_space<vmem>>, vector<16x128xf32>
    tpu.vector_store %arg7[%c0_11, %c0_12], %17 {strides = array<i32>} : memref<16x128xf32, #tpu.memory_space<vmem>>, vector<16x128xf32>,
    return
  }
  func.func @transform_0(%arg0: i32, %arg1: i32) -> (i32, i32) {
    %c0_i32 = arith.constant 0 : i32
    %c0_i32_0 = arith.constant 0 : i32
    return %arg0, %c0_i32 : i32, i32
  }
  func.func @transform_1(%arg0: i32, %arg1: i32) -> (i32, i32) {
    %c0_i32 = arith.constant 0 : i32
    %c0_i32_0 = arith.constant 0 : i32
    return %arg0, %c0_i32 : i32, i32
  }
  func.func @transform_2(%arg0: i32, %arg1: i32) -> (i32, i32) {
    %c0_i32 = arith.constant 0 : i32
    %c0_i32_0 = arith.constant 0 : i32
    return %c0_i32, %arg1 : i32, i32
  }
  func.func @transform_3(%arg0: i32, %arg1: i32) -> (i32, i32) {
    %c0_i32 = arith.constant 0 : i32
    %c0_i32_0 = arith.constant 0 : i32
    return %c0_i32, %arg1 : i32, i32
  }
  func.func @transform_4(%arg0: i32, %arg1: i32) -> (i32, i32) {
    %c0_i32 = arith.constant 0 : i32
    %c0_i32_0 = arith.constant 0 : i32
    return %c0_i32, %arg1 : i32, i32
  }
  func.func @transform_5(%arg0: i32, %arg1: i32) -> (i32, i32) {
    %c0_i32 = arith.constant 0 : i32
    return %arg0, %arg1 : i32, i32
  }
}

</mosaic_0001>

<bundles_post_ra>
// kernel: tpu_custom_call.1
= control target key start
LH: loop header
LB: loop body
LE: loop exit
PB: predicated region body
PF: predicated region fallthrough
CT: control target
= control target key end

     0   :  { %10 = vsyncpa [#allocation3], 0  ;;  %s756_s0 = inlined_call_operand.hbm [shape: f32[16,128], index: 0, kind: input, shape index: {}]   ;;  %s757_s1 = inlined_call_operand.hbm [shape: f32[16,128], index: 1, kind: input, shape index: {}]   ;;  %s758_s2 = inlined_call_operand.hbm [shape: f32[128,128], index: 2, kind: input, shape index: {}]   ;;  %s759_s3 = inlined_call_operand.hbm [shape: f32[128,128], index: 3, kind: input, shape index: {}]   ;;  %s760_s4 = inlined_call_operand.vmem [shape: f32[1,128], index: 4, kind: input, shape index: {}]   ;;  %s761_s5 = inlined_call_operand.hbm [shape: f32[16,128], index: 5, kind: output, shape index: {}]  }
   0x1   :  { %11 = vsyncpa [#allocation6], 0 }
   0x2   :  { %12 = vsyncpa [#allocation9], 0 }
   0x3   :  { %13 = vsyncpa [#allocation4], 0  ;;  %s618_s18 = smov [#allocation5]   ;;  %s619_s20 = smov [#allocation2]  }
   0x4   :  { %s31_s19 = sshll.u32 %s618_s18, 4  ;;  %s19_s21 = sshll.u32 %s619_s20, 4  ;;  %s32_s19 = int_to_ptr.vmem [resolvable:$true] %s31_s19  ;;  %s655_s21 = int_to_ptr.vmem [resolvable:$true] %s19_s21 }
   0x5   :  { %s500_s24 = scalar_lea.hbm %s757_s1, 256 }
   0x6   :  { %p501_p0 = scmp.ne.s32.totalorder %s757_s1, %s500_s24  ;;  %p504_p1 = scmp.lt.u32.totalorder %s500_s24, %s757_s1 }
   0x8   :  { %p506_p2 = pnand %p504_p1, %p501_p0 }
   0xa   :  { %509 = shalt.err (!%p506_p2)
}
   0xb   :  { %s510_s29 = scalar_lea.vmem %s32_s19, 256  ;;  %p515_p4 = scmp.lt.s32.totalorder %s32_s19, %s32_s19 }
   0xc   :  { %p511_p3 = scmp.ne.s32.totalorder %s32_s19, %s510_s29  ;;  %p516_p5 = scmp.lt.s32.totalorder %s510_s29, %s510_s29 }
   0xe   :  { %p517_p6 = por %p516_p5, %p515_p4 }
  0x10   :  { %p518_p7 = pnand %p517_p6, %p511_p3 }
  0x12   :  { %521 = shalt.err (!%p518_p7)
}
  0x13   :  { %s620_s30 = smov 128   ;;  %s621_s6 = smov 8  }
  0x14   :  { %37 = dma.hbm_to_vmem [thread:$0]  %s757_s1, 256, %s32_s19, [#allocation6], %s620_s30, %s620_s30, %s621_s6  }
  0x15   :  { %s522_s11 = scalar_lea.hbm %s756_s0, 256 }
  0x16   :  { %p523_p8 = scmp.ne.s32.totalorder %s756_s0, %s522_s11  ;;  %p526_p9 = scmp.lt.u32.totalorder %s522_s11, %s756_s0 }
  0x18   :  { %p528_p10 = pnand %p526_p9, %p523_p8 }
  0x1a   :  { %531 = shalt.err (!%p528_p10)
}
  0x1b   :  { %s532_s16 = scalar_lea.vmem %s655_s21, 256  ;;  %p537_p12 = scmp.lt.s32.totalorder %s655_s21, %s655_s21 }
  0x1c   :  { %p533_p11 = scmp.ne.s32.totalorder %s655_s21, %s532_s16  ;;  %p538_p13 = scmp.lt.s32.totalorder %s532_s16, %s532_s16 }
  0x1e   :  { %p539_p0 = por %p538_p13, %p537_p12 }
  0x20   :  { %p540_p1 = pnand %p539_p0, %p533_p11 }
  0x22   :  { %543 = shalt.err (!%p540_p1)
}
  0x23   :  { %25 = dma.hbm_to_vmem [thread:$0]  %s756_s0, 256, %s655_s21, [#allocation3], %s620_s30, %s620_s30, %s621_s6  }
  0x24   :  { %s622_s18 = smov [#allocation7]   ;;  %s623_s20 = smov [#allocation8]  }
  0x25   :  { %s43_s19 = sshll.u32 %s622_s18, 4  ;;  %s55_s22 = sshll.u32 %s623_s20, 4  ;;  %s44_s19 = int_to_ptr.vmem [resolvable:$true] %s43_s19  ;;  %s692_s22 = int_to_ptr.vmem [resolvable:$true] %s55_s22 }
  0x26   :  { %s544_s25 = scalar_lea.hbm %s758_s2, 2048 }
  0x27   :  { %p545_p2 = scmp.ne.s32.totalorder %s758_s2, %s544_s25  ;;  %p548_p3 = scmp.lt.u32.totalorder %s544_s25, %s758_s2 }
  0x29   :  { %p550_p4 = pnand %p548_p3, %p545_p2 }
  0x2b   :  { %553 = shalt.err (!%p550_p4)
}
  0x2c   :  { %s554_s0 = scalar_lea.vmem %s44_s19, 2048  ;;  %p559_p6 = scmp.lt.s32.totalorder %s44_s19, %s44_s19 }
  0x2d   :  { %p555_p5 = scmp.ne.s32.totalorder %s44_s19, %s554_s0  ;;  %p560_p7 = scmp.lt.s32.totalorder %s554_s0, %s554_s0 }
  0x2f   :  { %p561_p8 = por %p560_p7, %p559_p6 }
  0x31   :  { %p562_p9 = pnand %p561_p8, %p555_p5 }
  0x33   :  { %565 = shalt.err (!%p562_p9)
}
  0x34   :  { %49 = dma.hbm_to_vmem [thread:$0]  %s758_s2, 2048, %s44_s19, [#allocation6], %s620_s30, %s620_s30, %s621_s6  }
  0x35   :  { %s566_s10 = scalar_lea.hbm %s759_s3, 2048 }
  0x36   :  { %p567_p10 = scmp.ne.s32.totalorder %s759_s3, %s566_s10  ;;  %p570_p11 = scmp.lt.u32.totalorder %s566_s10, %s759_s3 }
  0x38   :  { %p572_p12 = pnand %p570_p11, %p567_p10 }
  0x3a   :  { %575 = shalt.err (!%p572_p12)
}
  0x3b   :  { %s576_s15 = scalar_lea.vmem %s692_s22, 2048  ;;  %p581_p0 = scmp.lt.s32.totalorder %s692_s22, %s692_s22 }
  0x3c   :  { %p577_p13 = scmp.ne.s32.totalorder %s692_s22, %s576_s15  ;;  %p582_p1 = scmp.lt.s32.totalorder %s576_s15, %s576_s15 }
  0x3e   :  { %p583_p2 = por %p582_p1, %p581_p0 }
  0x40   :  { %p584_p3 = pnand %p583_p2, %p577_p13 }
  0x42   :  { %587 = shalt.err (!%p584_p3)
}
  0x43   :  { %61 = dma.hbm_to_vmem [thread:$0]  %s759_s3, 2048, %s692_s22, [#allocation9], %s620_s30, %s620_s30, %s621_s6  }
  0x44   :  { %610 = dma.done.wait [#allocation3], 256  }
  0x45   :  { %611 = vsyncadd [#allocation3], 4294967040 }
  0x46   :  { %612 = dma.done.wait [#allocation6], 2304  }
  0x47   :  { %613 = vsyncadd [#allocation6], 4294964992 }
  0x48   :  { %614 = dma.done.wait [#allocation9], 2048  }
  0x49   :  { %615 = vsyncadd [#allocation9], 4294965248  ;;  %v96_v0 = vld [vmem:[#allocation8] sm:$0xff]  ;;  %v97_v1 = vld [vmem:[#allocation8 + $0x8] sm:$0xff] }
  0x4a   :  { %v80_v2 = vld [vmem:[#allocation7] sm:$0xff]  ;;  %v419_v3 = vpack.c.bf16 %v97_v1, %v96_v0  ;;  %v81_v4 = vld [vmem:[#allocation7 + $0x8] sm:$0xff]  ;;  %v98_v5 = vld [vmem:[#allocation8 + $0x10] sm:$0xff] }
  0x4b   :  { %v99_v6 = vld [vmem:[#allocation8 + $0x18] sm:$0xff]  ;;  %v451_v7 = vpack.c.bf16 %v81_v4, %v80_v2  ;;  %v82_v9 = vld [vmem:[#allocation7 + $0x10] sm:$0xff]  ;;  %v100_v11 = vld [vmem:[#allocation8 + $0x20] sm:$0xff] }
  0x4c   :  { %v423_v8 = vpack.c.bf16 %v99_v6, %v98_v5  ;;  %v83_v10 = vld [vmem:[#allocation7 + $0x18] sm:$0xff]  ;;  %420 = vmatprep.subr.bf16.mxu1 %v419_v3  ;;  %v101_v13 = vld [vmem:[#allocation8 + $0x28] sm:$0xff]  ;;  %v84_v14 = vld [vmem:[#allocation7 + $0x20] sm:$0xff] }
  0x4d   :  { %v455_v12 = vpack.c.bf16 %v83_v10, %v82_v9  ;;  %v85_v15 = vld [vmem:[#allocation7 + $0x28] sm:$0xff]  ;;  %452 = vmatprep.subr.bf16.mxu0 %v451_v7  ;;  %422 = vmatpush3.bf16.msra.mxu1 %v419_v3  ;;  %v427_v16 = vpack.c.bf16 %v101_v13, %v100_v11  ;;  %v102_v18 = vld [vmem:[#allocation8 + $0x30] sm:$0xff]  ;;  %v103_v19 = vld [vmem:[#allocation8 + $0x38] sm:$0xff] }
  0x4e   :  { %454 = vmatpush3.bf16.msra.mxu0 %v451_v7  ;;  %424 = vmatprep.subr.bf16.mxu1 %v423_v8  ;;  %v459_v17 = vpack.c.bf16 %v85_v15, %v84_v14  ;;  %v86_v20 = vld [vmem:[#allocation7 + $0x30] sm:$0xff]  ;;  %v87_v21 = vld [vmem:[#allocation7 + $0x38] sm:$0xff]  ;;  %v431_v22 = vpack.c.bf16 %v103_v19, %v102_v18  ;;  %v104_v24 = vld [vmem:[#allocation8 + $0x40] sm:$0xff] }
  0x4f   :  { %456 = vmatprep.subr.bf16.mxu0 %v455_v12  ;;  %v463_v23 = vpack.c.bf16 %v87_v21, %v86_v20  ;;  %v105_v25 = vld [vmem:[#allocation8 + $0x48] sm:$0xff]  ;;  %v729_v26 = vld [vmem:[#allocation5] sm:$0xff]  ;;  %v88_v27 = vld [vmem:[#allocation7 + $0x40] sm:$0xff] }
  0x50   :  { %v89_v28 = vld [vmem:[#allocation7 + $0x48] sm:$0xff]  ;;  %381 = vmatprep.mubr.f32.mxu1 %v729_v26  ;;  %v732_v29 = vld [vmem:[#allocation2] sm:$0xff]  ;;  %v435_v30 = vpack.c.bf16 %v105_v25, %v104_v24  ;;  %v106_v32 = vld [vmem:[#allocation8 + $0x50] sm:$0xff] }
  0x51   :  { %426 = vmatpush3.bf16.msra.mxu1 %v423_v8  ;;  %416 = vmatprep.mubr.f32.mxu0 %v732_v29  ;;  %v467_v31 = vpack.c.bf16 %v89_v28, %v88_v27  ;;  %v107_v33 = vld [vmem:[#allocation8 + $0x58] sm:$0xff]  ;;  %v90_v34 = vld [vmem:[#allocation7 + $0x50] sm:$0xff]  ;;  %v108_v38 = vld [vmem:[#allocation8 + $0x60] sm:$0xff]  ;;  %v283_v4 = vsub.f32 %v732_v29, %v729_v26 }
  0x52   :  { %458 = vmatpush3.bf16.msra.mxu0 %v455_v12  ;;  %428 = vmatprep.subr.bf16.mxu1 %v427_v16  ;;  %v91_v35 = vld [vmem:[#allocation7 + $0x58] sm:$0xff]  ;;  %v439_v36 = vpack.c.bf16 %v107_v33, %v106_v32  ;;  %v109_v39 = vld [vmem:[#allocation8 + $0x68] sm:$0xff]  ;;  %v92_v40 = vld [vmem:[#allocation7 + $0x60] sm:$0xff] }
  0x53   :  { %460 = vmatprep.subr.bf16.mxu0 %v459_v17  ;;  %v471_v37 = vpack.c.bf16 %v91_v35, %v90_v34  ;;  %v93_v41 = vld [vmem:[#allocation7 + $0x68] sm:$0xff]  ;;  %v443_v42 = vpack.c.bf16 %v109_v39, %v108_v38  ;;  %v110_v44 = vld [vmem:[#allocation8 + $0x70] sm:$0xff]  ;;  %v111_v45 = vld [vmem:[#allocation8 + $0x78] sm:$0xff] }
  0x54   :  { %v475_v43 = vpack.c.bf16 %v93_v41, %v92_v40  ;;  %v94_v46 = vld [vmem:[#allocation7 + $0x70] sm:$0xff]  ;;  %v95_v47 = vld [vmem:[#allocation7 + $0x78] sm:$0xff]  ;;  %v447_v48 = vpack.c.bf16 %v111_v45, %v110_v44  ;;  %v77_v51 = vld [vmem:[#allocation2 + $0x8] sm:$0xff] }
  0x55   :  { %430 = vmatpush3.bf16.msra.mxu1 %v427_v16  ;;  %v479_v49 = vpack.c.bf16 %v95_v47, %v94_v46  ;;  %v79_v50 = vld [vmem:[#allocation5 + $0x8] sm:$0xff]  ;;  %v310_v54 = vld [vmem:[%s760_s4] ss:$0 sm:$0xff]  ;;  %s624_s4 = smov [#allocation10]  }
  0x56   :  { %462 = vmatpush3.bf16.msra.mxu0 %v459_v17  ;;  %432 = vmatprep.subr.bf16.mxu1 %v431_v22  ;;  %v284_v3 = vsub.f32 %v77_v51, %v79_v50  ;;  %s296_s17 = sshll.u32 %s624_s4, 4  ;;  %s297_s17 = int_to_ptr.vmem [resolvable:$true] %s296_s17 }
  0x57   :  { %464 = vmatprep.subr.bf16.mxu0 %v463_v23  ;;  %s588_s18 = scalar_lea.vmem %s297_s17, 256  ;;  %p593_p5 = scmp.lt.s32.totalorder %s297_s17, %s297_s17 }
  0x58   :  { %p589_p4 = scmp.ne.s32.totalorder %s297_s17, %s588_s18  ;;  %p594_p6 = scmp.lt.s32.totalorder %s588_s18, %s588_s18 }
  0x59   :  { %434 = vmatpush3.bf16.msra.mxu1 %v431_v22 }
  0x5a   :  { %466 = vmatpush3.bf16.msra.mxu0 %v463_v23  ;;  %436 = vmatprep.subr.bf16.mxu1 %v435_v30  ;;  %p595_p7 = por %p594_p6, %p593_p5 }
  0x5b   :  { %468 = vmatprep.subr.bf16.mxu0 %v467_v31 }
  0x5c   :  { %p596_p8 = pnand %p595_p7, %p589_p4 }
  0x5d   :  { %438 = vmatpush3.bf16.msra.mxu1 %v435_v30 }
  0x5e   :  { %470 = vmatpush3.bf16.msra.mxu0 %v467_v31  ;;  %440 = vmatprep.subr.bf16.mxu1 %v439_v36 }
  0x5f   :  { %472 = vmatprep.subr.bf16.mxu0 %v471_v37 }
  0x61   :  { %442 = vmatpush3.bf16.msra.mxu1 %v439_v36 }
  0x62   :  { %474 = vmatpush3.bf16.msra.mxu0 %v471_v37  ;;  %444 = vmatprep.subr.bf16.mxu1 %v443_v42 }
  0x63   :  { %476 = vmatprep.subr.bf16.mxu0 %v475_v43 }
  0x65   :  { %446 = vmatpush3.bf16.msra.mxu1 %v443_v42 }
  0x66   :  { %478 = vmatpush3.bf16.msra.mxu0 %v475_v43  ;;  %448 = vmatprep.subr.bf16.mxu1 %v447_v48 }
  0x67   :  { %480 = vmatprep.subr.bf16.mxu0 %v479_v49 }
  0x69   :  { %450 = vmatpush3.bf16.msra.mxu1 %v447_v48 }
  0x6a   :  { %482 = vmatpush3.bf16.msra.mxu0 %v479_v49 }
  0x6c   :  { %382 = vmatmul.mubr.f32.vlgmr.msra.gmra.mrb[0].mxu1 %v79_v50 }
  0x6d   :  { %417 = vmatmul.mubr.f32.vlgmr.msra.gmra.mrb[0].mxu0 %v77_v51 }
 0x13f   :  { %v383_v52 = vpop.f32.mrb[0].mxu1 }
 0x140   :  { %v418_v53 = vpop.f32.mrb[0].mxu0  ;;  %v178_v55 = vpop.f32.mrb[1].mxu1 }
 0x141   :  { %v259_v56 = vadd.f32 %v418_v53, %v383_v52  ;;  %v253_v57 = vpop.f32.mrb[1].mxu0 }
 0x142   :  { %v254_v58 = vadd.f32 %v253_v57, %v178_v55 }
 0x143   :  { %v270_v59 = vadd.f32 %v310_v54, %v259_v56 }
 0x144   :  { %v269_v60 = vadd.f32 %v310_v54, %v254_v58 }
 0x145   :  { %v312_v61 = vmul.f32 -1.442695, %v270_v59 }
 0x146   :  { %v311_v62 = vmul.f32 -1.442695, %v269_v60 }
 0x147   :  { %492 = vpow2.f32 %v312_v61 }
 0x148   :  { %494 = vpow2.f32 %v311_v62 }
 0x151   :  { %v493_v63 = vpop.eup %492 }
 0x152   :  { %v495_v0 = vpop.eup %494  ;;  %v278_v1 = vadd.f32 1.0, %v493_v63 }
 0x153   :  { %v277_v2 = vadd.f32 1.0, %v495_v0 }
 0x154   :  { %496 = vrcp.f32 %v278_v1 }
 0x155   :  { %498 = vrcp.f32 %v277_v2 }
 0x15e   :  { %v497_v5 = vpop.eup %496 }
 0x15f   :  { %v499_v6 = vpop.eup %498  ;;  %v286_v7 = vmul.f32 %v497_v5, %v284_v3 }
 0x160   :  { %v285_v8 = vmul.f32 %v499_v6, %v283_v4 }
 0x161   :  { %v288_v9 = vadd.f32 %v286_v7, %v79_v50 }
 0x162   :  { %v287_v10 = vadd.f32 %v285_v8, %v729_v26 }
 0x163   :  { %290 = vst [vmem:[#allocation10 + $0x8] sm:$0xff] %v288_v9 }
 0x164   :  { %289 = vst [vmem:[#allocation10] sm:$0xff] %v287_v10 }
 0x165   :  { %599 = shalt.err (!%p596_p8)
}
 0x166   :  { %s600_s22 = scalar_lea.hbm %s761_s5, 256 }
 0x167   :  { %p601_p9 = scmp.ne.s32.totalorder %s761_s5, %s600_s22  ;;  %p604_p10 = scmp.lt.u32.totalorder %s600_s22, %s761_s5 }
 0x169   :  { %p606_p11 = pnand %p604_p10, %p601_p9 }
 0x16b   :  { %609 = shalt.err (!%p606_p11)
}
 0x16c   :  { %302 = dma.vmem_to_hbm [thread:$0]  %s297_s17, 256, %s761_s5, [#allocation4], %s620_s30, %s620_s30, %s621_s6  }
 0x16d   :  { %616 = dma.done.wait [#allocation4], 256  }
 0x16e   :  { %617 = vsyncadd [#allocation4], 4294967040 }
 0x16f   :  { %306 = vsyncpa [#allocation3], 1 }
 0x170   :  { %307 = vsyncpa [#allocation6], 1 }
 0x171   :  { %308 = vsyncpa [#allocation9], 1 }
 0x172   :  { %309 = vsyncpa [#allocation4], 1 }

</bundles_post_ra>
